<compile_context>
chip_gen: v7x
topology: tpu7x:2x2x1
jax: 0.10.0
libtpu: 0.0.40
codegen_flags: <defaults>
</compile_context>

<pallas_src>
import functools

import jax
import jax.numpy as jnp
from jax import lax
from jax.experimental import pallas as pl
from jax.experimental.pallas import tpu as pltpu

_LN_EPS = 1e-6
_SQRT_HALF = 0.7071067811865476


def _layernorm(x, gamma, beta):
    mu = jnp.mean(x, axis=-1, keepdims=True)
    var = jnp.mean(jnp.square(x - mu), axis=-1, keepdims=True)
    return (x - mu) * lax.rsqrt(var + _LN_EPS) * gamma + beta


def _erf_poly(x):
    # Abramowitz & Stegun 7.1.26 (max abs err ~1.5e-7). Uses only exp/mul/add/where,
    # so it lowers cleanly in Mosaic (no reliance on an erf primitive).
    a1, a2, a3, a4, a5 = (0.254829592, -0.284496736, 1.421413741,
                          -1.453152027, 1.061405429)
    p = 0.3275911
    s = jnp.where(x >= 0.0, 1.0, -1.0)
    ax = jnp.abs(x)
    t = 1.0 / (1.0 + p * ax)
    poly = ((((a5 * t + a4) * t + a3) * t + a2) * t + a1) * t
    return s * (1.0 - poly * jnp.exp(-ax * ax))


def _gelu_exact(x):
    # torch.nn.GELU default (erf form), matching timm's Mlp.
    return 0.5 * x * (1.0 + _erf_poly(x * _SQRT_HALF))


# ----------------------------------------------------------------------------
# Kernel 1: fused attention block (LN1 + QKV + softmax + proj + residual),
#           also emits the cls-token attention row per head.
# ----------------------------------------------------------------------------
def _attn_block_kernel(x_ref, g_ref, b_ref, wqkv_ref, bqkv_ref, wp_ref, bp_ref,
                       y_ref, cls_ref, *, num_heads, head_dim):
    x = x_ref[0].astype(jnp.float32)                             # (N, C)
    xn = _layernorm(x, g_ref[...], b_ref[...])
    qkv = jnp.dot(xn, wqkv_ref[...], preferred_element_type=jnp.float32)
    qkv = qkv + bqkv_ref[...]                                    # (N, 3C)
    C = num_heads * head_dim
    scale = head_dim ** -0.5
    q = qkv[:, 0 * C:1 * C]
    k = qkv[:, 1 * C:2 * C]
    v = qkv[:, 2 * C:3 * C]
    outs = []
    cls_rows = []
    for h in range(num_heads):                                   # static unroll
        sl = slice(h * head_dim, (h + 1) * head_dim)
        qh = q[:, sl] * scale
        kh = k[:, sl]
        vh = v[:, sl]
        s = lax.dot_general(qh, kh, (((1,), (1,)), ((), ())),
                            preferred_element_type=jnp.float32)  # (N, N)
        s = s - jnp.max(s, axis=-1, keepdims=True)
        p = jnp.exp(s)
        p = p / jnp.sum(p, axis=-1, keepdims=True)
        cls_rows.append(p[0:1, :])                               # cls query row
        outs.append(jnp.dot(p, vh, preferred_element_type=jnp.float32))
    attn_cat = jnp.concatenate(outs, axis=-1)                    # (N, C)
    proj = jnp.dot(attn_cat, wp_ref[...], preferred_element_type=jnp.float32)
    proj = proj + bp_ref[...]
    y_ref[0] = (x + proj).astype(y_ref.dtype)
    cls_ref[0] = jnp.concatenate(cls_rows, axis=0).astype(cls_ref.dtype)


def attention_block(x, ln_g, ln_b, w_qkv, b_qkv, w_proj, b_proj, num_heads):
    B, N, C = x.shape
    head_dim = C // num_heads
    kernel = functools.partial(_attn_block_kernel, num_heads=num_heads,
                               head_dim=head_dim)
    y, cls_attn = pl.pallas_call(
        kernel,
        out_shape=(jax.ShapeDtypeStruct((B, N, C), x.dtype),
                   jax.ShapeDtypeStruct((B, num_heads, N), jnp.float32)),
        grid_spec=pltpu.PrefetchScalarGridSpec(
            num_scalar_prefetch=0,
            grid=(B,),
            in_specs=[
                pl.BlockSpec((1, N, C), lambda b: (b, 0, 0)),
                pl.BlockSpec((1, C), lambda b: (0, 0)),
                pl.BlockSpec((1, C), lambda b: (0, 0)),
                pl.BlockSpec((C, 3 * C), lambda b: (0, 0)),
                pl.BlockSpec((1, 3 * C), lambda b: (0, 0)),
                pl.BlockSpec((C, C), lambda b: (0, 0)),
                pl.BlockSpec((1, C), lambda b: (0, 0)),
            ],
            out_specs=[
                pl.BlockSpec((1, N, C), lambda b: (b, 0, 0)),
                pl.BlockSpec((1, num_heads, N), lambda b: (b, 0, 0)),
            ]),
        compiler_params=pltpu.CompilerParams(
            dimension_semantics=("parallel",)),
    )(x, ln_g.reshape(1, C), ln_b.reshape(1, C),
      w_qkv, b_qkv.reshape(1, 3 * C), w_proj, b_proj.reshape(1, C))
    return y, cls_attn


# ----------------------------------------------------------------------------
# Kernel 2: fused MLP block (LN2 + FC1 + GELU + FC2 + residual), M-tiled over
#           the flattened (B*N) rows; weights resident across the grid.
# ----------------------------------------------------------------------------
def _mlp_block_kernel(x_ref, g_ref, b_ref, w1_ref, b1_ref, w2_ref, b2_ref, o_ref):
    x = x_ref[...].astype(jnp.float32)                           # (TM, C)
    xn = _layernorm(x, g_ref[...], b_ref[...])
    h = jnp.dot(xn, w1_ref[...], preferred_element_type=jnp.float32) + b1_ref[...]
    h = _gelu_exact(h)
    out = jnp.dot(h, w2_ref[...], preferred_element_type=jnp.float32) + b2_ref[...]
    o_ref[...] = (x + out).astype(o_ref.dtype)


def mlp_block(x, ln_g, ln_b, w1, b1, w2, b2):
    B, N, C = x.shape
    Dh = w1.shape[1]
    M = B * N
    x2 = x.reshape(M, C)
    if M % 256 == 0:
        tile_m = 256
    elif M % 128 == 0:
        tile_m = 128
    else:
        tile_m = M  # small / ragged demo sizes: single full tile
    out = pl.pallas_call(
        _mlp_block_kernel,
        out_shape=jax.ShapeDtypeStruct((M, C), x.dtype),
        grid_spec=pltpu.PrefetchScalarGridSpec(
            num_scalar_prefetch=0,
            grid=(M // tile_m,),
            in_specs=[
                pl.BlockSpec((tile_m, C), lambda i: (i, 0)),
                pl.BlockSpec((1, C), lambda i: (0, 0)),
                pl.BlockSpec((1, C), lambda i: (0, 0)),
                pl.BlockSpec((C, Dh), lambda i: (0, 0)),
                pl.BlockSpec((1, Dh), lambda i: (0, 0)),
                pl.BlockSpec((Dh, C), lambda i: (0, 0)),
                pl.BlockSpec((1, C), lambda i: (0, 0)),
            ],
            out_specs=pl.BlockSpec((tile_m, C), lambda i: (i, 0))),
        compiler_params=pltpu.CompilerParams(
            dimension_semantics=("parallel",)),
    )(x2, ln_g.reshape(1, C), ln_b.reshape(1, C), w1, b1.reshape(1, Dh),
      w2, b2.reshape(1, C))
    return out.reshape(B, N, C)


# ----------------------------------------------------------------------------
# Kernel 3: fused 2-layer GCN per batch element (both graph convs, no bias).
# ----------------------------------------------------------------------------
def _gcn_kernel(si_ref, adj_ref, w1_ref, w2_ref, o_ref):
    si = si_ref[0].astype(jnp.float32)                           # (HW, 2)
    adj = adj_ref[0].astype(jnp.float32)                         # (HW, HW)
    s = jnp.dot(si, w1_ref[...], preferred_element_type=jnp.float32)
    s = jnp.dot(adj, s, preferred_element_type=jnp.float32)
    s = jnp.where(s >= 0.0, s, 0.2 * s)   # LeakyReLU(0.2) of gc1 (dropout = id, eval)
    s = jnp.maximum(s, 0.0)               # F.relu between the two GCN layers
    # TODO(synk): F.dropout / nn.Dropout treated as identity (deterministic inference).
    s = jnp.dot(s, w2_ref[...], preferred_element_type=jnp.float32)
    s = jnp.dot(adj, s, preferred_element_type=jnp.float32)
    s = jnp.where(s >= 0.0, s, 0.2 * s)   # LeakyReLU(0.2) of gc2
    o_ref[0] = s.astype(o_ref.dtype)


def gcn(structure_info, adj, w1, w2):
    B, HW, F = structure_info.shape
    Dh = w1.shape[1]
    E = w2.shape[1]
    return pl.pallas_call(
        _gcn_kernel,
        out_shape=jax.ShapeDtypeStruct((B, HW, E), jnp.float32),
        grid_spec=pltpu.PrefetchScalarGridSpec(
            num_scalar_prefetch=0,
            grid=(B,),
            in_specs=[
                pl.BlockSpec((1, HW, F), lambda b: (b, 0, 0)),
                pl.BlockSpec((1, HW, HW), lambda b: (b, 0, 0)),
                pl.BlockSpec((F, Dh), lambda b: (0, 0)),
                pl.BlockSpec((Dh, E), lambda b: (0, 0)),
            ],
            out_specs=pl.BlockSpec((1, HW, E), lambda b: (b, 0, 0))),
        compiler_params=pltpu.CompilerParams(
            dimension_semantics=("parallel",)),
    )(structure_info, adj, w1, w2)


# ----------------------------------------------------------------------------
# Plain-JAX glue: RelativeCoordPredictor (mask/threshold/argmax/atan2/gathers).
# ----------------------------------------------------------------------------
def relative_coord_predictor(x):
    # x: (B, C, H, W) attention map (C = num_heads)
    B, C, H, W = x.shape
    HW = H * W
    mask = jnp.sum(x, axis=1).reshape(B, HW)
    thresholds = jnp.mean(mask, axis=1, keepdims=True)
    binary_mask = (mask > thresholds).astype(x.dtype)                  # (B, HW)
    masked_x = x * binary_mask.reshape(B, 1, H, W)
    masked_x = masked_x.reshape(B, C, HW).transpose(0, 2, 1)           # (B, HW, C)
    reduced_x_max_index = jnp.argmax(jnp.mean(masked_x, axis=-1), axis=-1)
    v = jnp.arange(H, dtype=jnp.float32)
    label = jnp.stack(jnp.meshgrid(v, v, indexing="ij"), axis=-1).reshape(HW, 2)
    basic_anchor = label[reduced_x_max_index]                          # (B, 2)
    rel = (label[None, :, :] - basic_anchor[:, None, :]) * (1.0 / H)
    rel_dist = jnp.sqrt(jnp.sum(rel * rel, axis=-1))                   # (B, HW)
    rel_angle = jnp.arctan2(rel[..., 1], rel[..., 0]) * (0.5 / jnp.pi) + 0.5
    rel_dist = rel_dist * binary_mask
    rel_angle = rel_angle * binary_mask
    structure_info = jnp.stack([rel_dist, rel_angle], axis=-1)         # (B, HW, 2)
    pos = jnp.mean(masked_x, axis=-1, keepdims=True)                   # (B, HW, 1)
    position_weight = pos @ jnp.swapaxes(pos, 1, 2)                    # (B, HW, HW)
    return structure_info, basic_anchor, position_weight, reduced_x_max_index


# ----------------------------------------------------------------------------
# Full PartStructureLayer forward.
# ----------------------------------------------------------------------------
def part_structure_layer_forward(hidden_states, p):
    num_heads = p["num_heads"]
    y, cls_attn = attention_block(hidden_states, p["ln1_g"], p["ln1_b"],
                                  p["w_qkv"], p["b_qkv"], p["w_proj"],
                                  p["b_proj"], num_heads)
    y = mlp_block(y, p["ln2_g"], p["ln2_b"], p["w_fc1"], p["b_fc1"],
                  p["w_fc2"], p["b_fc2"])
    B, N, C = y.shape
    num_patch = N - 1
    H = int(round(num_patch ** 0.5))
    # part_attention: cls-token attention over patch tokens, per head.
    attn_map = cls_attn[:, :, 1:].reshape(B, num_heads, H, H)
    # part_structure
    structure_info, anchor, position_weight, _ = relative_coord_predictor(attn_map)
    structure_info = gcn(structure_info, position_weight, p["w_gc1"], p["w_gc2"])
    idx = (anchor[:, 0] * H + anchor[:, 1]).astype(jnp.int32)          # (B,)
    structure = structure_info[jnp.arange(B), idx]                     # (B, C)
    y = y.at[:, 0].add(structure.astype(y.dtype))
    # Note: self.cls_token attribute capture is a side effect, not part of the output.
    return y


# ----------------------------------------------------------------------------
# Pure-JAX reference (no Pallas) for the correctness check.
# ----------------------------------------------------------------------------
def reference_forward(x, p):
    B, N, C = x.shape
    nh = p["num_heads"]
    hd = C // nh
    xn = _layernorm(x, p["ln1_g"], p["ln1_b"])
    qkv = xn @ p["w_qkv"] + p["b_qkv"]
    qkv = qkv.reshape(B, N, 3, nh, hd).transpose(2, 0, 3, 1, 4)
    q, k, v = qkv[0], qkv[1], qkv[2]
    q = q * (hd ** -0.5)
    attn = jnp.einsum("bhnd,bhmd->bhnm", q, k)
    attn = jax.nn.softmax(attn, axis=-1)
    saved_attn = attn
    o = jnp.einsum("bhnm,bhmd->bhnd", attn, v)
    o = o.transpose(0, 2, 1, 3).reshape(B, N, C)
    y = x + (o @ p["w_proj"] + p["b_proj"])
    yn = _layernorm(y, p["ln2_g"], p["ln2_b"])
    h = jax.nn.gelu(yn @ p["w_fc1"] + p["b_fc1"], approximate=False)
    y = y + (h @ p["w_fc2"] + p["b_fc2"])
    num_patch = N - 1
    H = int(round(num_patch ** 0.5))
    attn_map = saved_attn[:, :, 0, 1:].reshape(B, nh, H, H)
    si, anchor, pw, _ = relative_coord_predictor(attn_map)
    s = si @ p["w_gc1"]
    s = pw @ s
    s = jnp.where(s >= 0.0, s, 0.2 * s)
    s = jnp.maximum(s, 0.0)
    s = s @ p["w_gc2"]
    s = pw @ s
    s = jnp.where(s >= 0.0, s, 0.2 * s)
    idx = (anchor[:, 0] * H + anchor[:, 1]).astype(jnp.int32)
    structure = s[jnp.arange(B), idx]
    return y.at[:, 0].add(structure.astype(y.dtype))


if __name__ == "__main__":
    B = 2
    num_heads = 4
    head_dim = 8
    hidden_size = num_heads * head_dim          # 32
    H = 4                                       # patch grid side
    N = H * H + 1                               # 17 tokens (cls + patches)
    mlp_dim = 4 * hidden_size                   # 128
    gcn_hidden = 512                            # fixed by the module (GCN(2, 512, hidden))

    key = jax.random.PRNGKey(0)
    ks = jax.random.split(key, 13)
    x = jax.random.normal(ks[0], (B, N, hidden_size), dtype=jnp.float32)

    params = {
        "num_heads": num_heads,
        "ln1_g": jnp.ones((hidden_size,), jnp.float32)
                 + 0.02 * jax.random.normal(ks[1], (hidden_size,)),
        "ln1_b": 0.02 * jax.random.normal(ks[2], (hidden_size,)),
        "w_qkv": 0.05 * jax.random.normal(ks[3], (hidden_size, 3 * hidden_size)),
        "b_qkv": 0.02 * jax.random.normal(ks[4], (3 * hidden_size,)),
        "w_proj": 0.05 * jax.random.normal(ks[5], (hidden_size, hidden_size)),
        "b_proj": 0.02 * jax.random.normal(ks[6], (hidden_size,)),
        "ln2_g": jnp.ones((hidden_size,), jnp.float32),
        "ln2_b": jnp.zeros((hidden_size,), jnp.float32),
        "w_fc1": 0.05 * jax.random.normal(ks[7], (hidden_size, mlp_dim)),
        "b_fc1": 0.02 * jax.random.normal(ks[8], (mlp_dim,)),
        "w_fc2": 0.05 * jax.random.normal(ks[9], (mlp_dim, hidden_size)),
        "b_fc2": 0.02 * jax.random.normal(ks[10], (hidden_size,)),
        "w_gc1": 0.05 * jax.random.normal(ks[11], (2, gcn_hidden)),
        "w_gc2": 0.05 * jax.random.normal(ks[12], (gcn_hidden, hidden_size)),
    }

    out = part_structure_layer_forward(x, params)
    out = jax.block_until_ready(out)
    assert out.shape == (B, N, hidden_size), out.shape

    ref = jax.block_until_ready(reference_forward(x, params))
    if not jnp.allclose(out, ref, atol=2e-3, rtol=2e-3):
        max_err = float(jnp.max(jnp.abs(out - ref)))
        raise AssertionError(f"Pallas forward mismatch vs reference, max|diff|={max_err}")

    print("KERNEL_OK")
</pallas_src>

<mosaic_0001>
module attributes {stable_mosaic.version = 11 : i64} {
  func.func @_attn_block_kernel(%arg0: i32, %arg1: memref<1x17x32xf32, #tpu.memory_space<vmem>>, %arg2: memref<1x32xf32, #tpu.memory_space<vmem>>, %arg3: memref<1x32xf32, #tpu.memory_space<vmem>>, %arg4: memref<32x96xf32, #tpu.memory_space<vmem>>, %arg5: memref<1x96xf32, #tpu.memory_space<vmem>>, %arg6: memref<32x32xf32, #tpu.memory_space<vmem>>, %arg7: memref<1x32xf32, #tpu.memory_space<vmem>>, %arg8: memref<1x17x32xf32, #tpu.memory_space<vmem>>, %arg9: memref<1x4x17xf32, #tpu.memory_space<vmem>>) attributes {dimension_semantics = [#tpu.dimension_semantics<parallel>], iteration_bounds = array<i64: 2>, scalar_prefetch = 0 : i64, scratch_operands = 0 : i64, tpu.core_type = #tpu.core_type<tc>, window_params = [{transform_indices = @transform_0, window_bounds = array<i64: 1, 17, 32>}, {pipeline_mode = #tpu.pipeline_mode<synchronous>, transform_indices = @transform_1, window_bounds = array<i64: 1, 32>}, {pipeline_mode = #tpu.pipeline_mode<synchronous>, transform_indices = @transform_2, window_bounds = array<i64: 1, 32>}, {pipeline_mode = #tpu.pipeline_mode<synchronous>, transform_indices = @transform_3, window_bounds = array<i64: 32, 96>}, {pipeline_mode = #tpu.pipeline_mode<synchronous>, transform_indices = @transform_4, window_bounds = array<i64: 1, 96>}, {pipeline_mode = #tpu.pipeline_mode<synchronous>, transform_indices = @transform_5, window_bounds = array<i64: 32, 32>}, {pipeline_mode = #tpu.pipeline_mode<synchronous>, transform_indices = @transform_6, window_bounds = array<i64: 1, 32>}, {transform_indices = @transform_7, window_bounds = array<i64: 1, 17, 32>}, {transform_indices = @transform_8, window_bounds = array<i64: 1, 4, 17>}]} {
    %c0 = arith.constant 0 : index
    %c0_0 = arith.constant 0 : index
    %c0_1 = arith.constant 0 : index
    %0 = vector.load %arg1[%c0, %c0_0, %c0_1] : memref<1x17x32xf32, #tpu.memory_space<vmem>>, vector<1x17x32xf32>
    %1 = vector.shape_cast %0 : vector<1x17x32xf32> to vector<17x32xf32>
    %c0_2 = arith.constant 0 : index
    %c0_3 = arith.constant 0 : index
    %2 = vector.load %arg2[%c0_2, %c0_3] : memref<1x32xf32, #tpu.memory_space<vmem>>, vector<1x32xf32>
    %c0_4 = arith.constant 0 : index
    %c0_5 = arith.constant 0 : index
    %3 = vector.load %arg3[%c0_4, %c0_5] : memref<1x32xf32, #tpu.memory_space<vmem>>, vector<1x32xf32>
    %cst = arith.constant dense<0.000000e+00> : vector<17xf32>
    %4 = vector.multi_reduction <add>, %1, %cst [1] : vector<17x32xf32> to vector<17xf32>
    %5 = vector.shape_cast %4 : vector<17xf32> to vector<17x1xf32>
    %cst_6 = arith.constant 3.200000e+01 : f32
    %6 = vector.broadcast %cst_6 : f32 to vector<17x1xf32>
    %7 = arith.divf %5, %6 : vector<17x1xf32>
    %8 = vector.broadcast %7 : vector<17x1xf32> to vector<17x32xf32>
    %9 = arith.subf %1, %8 : vector<17x32xf32>
    %10 = arith.mulf %9, %9 : vector<17x32xf32>
    %cst_7 = arith.constant dense<0.000000e+00> : vector<17xf32>
    %11 = vector.multi_reduction <add>, %10, %cst_7 [1] : vector<17x32xf32> to vector<17xf32>
    %12 = vector.shape_cast %11 : vector<17xf32> to vector<17x1xf32>
    %cst_8 = arith.constant 3.200000e+01 : f32
    %13 = vector.broadcast %cst_8 : f32 to vector<17x1xf32>
    %14 = arith.divf %12, %13 : vector<17x1xf32>
    %15 = vector.broadcast %7 : vector<17x1xf32> to vector<17x32xf32>
    %16 = arith.subf %1, %15 : vector<17x32xf32>
    %cst_9 = arith.constant 9.99999997E-7 : f32
    %17 = vector.broadcast %cst_9 : f32 to vector<17x1xf32>
    %18 = arith.addf %14, %17 : vector<17x1xf32>
    %19 = math.rsqrt %18 : vector<17x1xf32>
    %20 = vector.broadcast %19 : vector<17x1xf32> to vector<17x32xf32>
    %21 = arith.mulf %16, %20 : vector<17x32xf32>
    %22 = vector.broadcast %2 : vector<1x32xf32> to vector<17x32xf32>
    %23 = arith.mulf %21, %22 : vector<17x32xf32>
    %24 = vector.broadcast %3 : vector<1x32xf32> to vector<17x32xf32>
    %25 = arith.addf %23, %24 : vector<17x32xf32>
    %c0_10 = arith.constant 0 : index
    %c0_11 = arith.constant 0 : index
    %26 = vector.load %arg4[%c0_10, %c0_11] : memref<32x96xf32, #tpu.memory_space<vmem>>, vector<32x96xf32>
    %cst_12 = arith.constant dense<0.000000e+00> : vector<17x96xf32>
    %27 = tpu.matmul %25, %26, %cst_12 {dimension_numbers = #tpu.dot_dimension_numbers<[1], [0], [0], [1], [0, 0, 1, 1], [], []>} : vector<17x32xf32>, vector<32x96xf32>, vector<17x96xf32> -> vector<17x96xf32>
    %c0_13 = arith.constant 0 : index
    %c0_14 = arith.constant 0 : index
    %28 = vector.load %arg5[%c0_13, %c0_14] : memref<1x96xf32, #tpu.memory_space<vmem>>, vector<1x96xf32>
    %29 = vector.broadcast %28 : vector<1x96xf32> to vector<17x96xf32>
    %30 = arith.addf %27, %29 : vector<17x96xf32>
    %31 = vector.extract_strided_slice %30 {offsets = [0, 0], sizes = [17, 32], strides = [1, 1]} : vector<17x96xf32> to vector<17x32xf32>
    %32 = vector.extract_strided_slice %30 {offsets = [0, 32], sizes = [17, 32], strides = [1, 1]} : vector<17x96xf32> to vector<17x32xf32>
    %33 = vector.extract_strided_slice %30 {offsets = [0, 64], sizes = [17, 32], strides = [1, 1]} : vector<17x96xf32> to vector<17x32xf32>
    %34 = vector.extract_strided_slice %31 {offsets = [0, 0], sizes = [17, 8], strides = [1, 1]} : vector<17x32xf32> to vector<17x8xf32>
    %cst_15 = arith.constant 0.353553385 : f32
    %35 = vector.broadcast %cst_15 : f32 to vector<17x8xf32>
    %36 = arith.mulf %34, %35 : vector<17x8xf32>
    %37 = vector.extract_strided_slice %32 {offsets = [0, 0], sizes = [17, 8], strides = [1, 1]} : vector<17x32xf32> to vector<17x8xf32>
    %38 = vector.extract_strided_slice %33 {offsets = [0, 0], sizes = [17, 8], strides = [1, 1]} : vector<17x32xf32> to vector<17x8xf32>
    %cst_16 = arith.constant dense<0.000000e+00> : vector<17x17xf32>
    %39 = tpu.matmul %36, %37, %cst_16 {dimension_numbers = #tpu.dot_dimension_numbers<[1], [1], [0], [0], [0, 0, 1, 0], [], []>} : vector<17x8xf32>, vector<17x8xf32>, vector<17x17xf32> -> vector<17x17xf32>
    %cst_17 = arith.constant dense<0xFF800000> : vector<17xf32>
    %40 = vector.multi_reduction <maximumf>, %39, %cst_17 [1] : vector<17x17xf32> to vector<17xf32>
    %41 = vector.shape_cast %40 : vector<17xf32> to vector<17x1xf32>
    %42 = vector.broadcast %41 : vector<17x1xf32> to vector<17x17xf32>
    %43 = arith.subf %39, %42 : vector<17x17xf32>
    %44 = math.exp %43 : vector<17x17xf32>
    %cst_18 = arith.constant dense<0.000000e+00> : vector<17xf32>
    %45 = vector.multi_reduction <add>, %44, %cst_18 [1] : vector<17x17xf32> to vector<17xf32>
    %46 = vector.shape_cast %45 : vector<17xf32> to vector<17x1xf32>
    %47 = vector.broadcast %46 : vector<17x1xf32> to vector<17x17xf32>
    %48 = arith.divf %44, %47 : vector<17x17xf32>
    %49 = vector.extract_strided_slice %48 {offsets = [0, 0], sizes = [1, 17], strides = [1, 1]} : vector<17x17xf32> to vector<1x17xf32>
    %cst_19 = arith.constant dense<0.000000e+00> : vector<17x8xf32>
    %50 = tpu.matmul %48, %38, %cst_19 {dimension_numbers = #tpu.dot_dimension_numbers<[1], [0], [0], [1], [0, 0, 1, 1], [], []>} : vector<17x17xf32>, vector<17x8xf32>, vector<17x8xf32> -> vector<17x8xf32>
    %51 = vector.extract_strided_slice %31 {offsets = [0, 8], sizes = [17, 8], strides = [1, 1]} : vector<17x32xf32> to vector<17x8xf32>
    %cst_20 = arith.constant 0.353553385 : f32
    %52 = vector.broadcast %cst_20 : f32 to vector<17x8xf32>
    %53 = arith.mulf %51, %52 : vector<17x8xf32>
    %54 = vector.extract_strided_slice %32 {offsets = [0, 8], sizes = [17, 8], strides = [1, 1]} : vector<17x32xf32> to vector<17x8xf32>
    %55 = vector.extract_strided_slice %33 {offsets = [0, 8], sizes = [17, 8], strides = [1, 1]} : vector<17x32xf32> to vector<17x8xf32>
    %cst_21 = arith.constant dense<0.000000e+00> : vector<17x17xf32>
    %56 = tpu.matmul %53, %54, %cst_21 {dimension_numbers = #tpu.dot_dimension_numbers<[1], [1], [0], [0], [0, 0, 1, 0], [], []>} : vector<17x8xf32>, vector<17x8xf32>, vector<17x17xf32> -> vector<17x17xf32>
    %cst_22 = arith.constant dense<0xFF800000> : vector<17xf32>
    %57 = vector.multi_reduction <maximumf>, %56, %cst_22 [1] : vector<17x17xf32> to vector<17xf32>
    %58 = vector.shape_cast %57 : vector<17xf32> to vector<17x1xf32>
    %59 = vector.broadcast %58 : vector<17x1xf32> to vector<17x17xf32>
    %60 = arith.subf %56, %59 : vector<17x17xf32>
    %61 = math.exp %60 : vector<17x17xf32>
    %cst_23 = arith.constant dense<0.000000e+00> : vector<17xf32>
    %62 = vector.multi_reduction <add>, %61, %cst_23 [1] : vector<17x17xf32> to vector<17xf32>
    %63 = vector.shape_cast %62 : vector<17xf32> to vector<17x1xf32>
    %64 = vector.broadcast %63 : vector<17x1xf32> to vector<17x17xf32>
    %65 = arith.divf %61, %64 : vector<17x17xf32>
    %66 = vector.extract_strided_slice %65 {offsets = [0, 0], sizes = [1, 17], strides = [1, 1]} : vector<17x17xf32> to vector<1x17xf32>
    %cst_24 = arith.constant dense<0.000000e+00> : vector<17x8xf32>
    %67 = tpu.matmul %65, %55, %cst_24 {dimension_numbers = #tpu.dot_dimension_numbers<[1], [0], [0], [1], [0, 0, 1, 1], [], []>} : vector<17x17xf32>, vector<17x8xf32>, vector<17x8xf32> -> vector<17x8xf32>
    %68 = vector.extract_strided_slice %31 {offsets = [0, 16], sizes = [17, 8], strides = [1, 1]} : vector<17x32xf32> to vector<17x8xf32>
    %cst_25 = arith.constant 0.353553385 : f32
    %69 = vector.broadcast %cst_25 : f32 to vector<17x8xf32>
    %70 = arith.mulf %68, %69 : vector<17x8xf32>
    %71 = vector.extract_strided_slice %32 {offsets = [0, 16], sizes = [17, 8], strides = [1, 1]} : vector<17x32xf32> to vector<17x8xf32>
    %72 = vector.extract_strided_slice %33 {offsets = [0, 16], sizes = [17, 8], strides = [1, 1]} : vector<17x32xf32> to vector<17x8xf32>
    %cst_26 = arith.constant dense<0.000000e+00> : vector<17x17xf32>
    %73 = tpu.matmul %70, %71, %cst_26 {dimension_numbers = #tpu.dot_dimension_numbers<[1], [1], [0], [0], [0, 0, 1, 0], [], []>} : vector<17x8xf32>, vector<17x8xf32>, vector<17x17xf32> -> vector<17x17xf32>
    %cst_27 = arith.constant dense<0xFF800000> : vector<17xf32>
    %74 = vector.multi_reduction <maximumf>, %73, %cst_27 [1] : vector<17x17xf32> to vector<17xf32>
    %75 = vector.shape_cast %74 : vector<17xf32> to vector<17x1xf32>
    %76 = vector.broadcast %75 : vector<17x1xf32> to vector<17x17xf32>
    %77 = arith.subf %73, %76 : vector<17x17xf32>
    %78 = math.exp %77 : vector<17x17xf32>
    %cst_28 = arith.constant dense<0.000000e+00> : vector<17xf32>
    %79 = vector.multi_reduction <add>, %78, %cst_28 [1] : vector<17x17xf32> to vector<17xf32>
    %80 = vector.shape_cast %79 : vector<17xf32> to vector<17x1xf32>
    %81 = vector.broadcast %80 : vector<17x1xf32> to vector<17x17xf32>
    %82 = arith.divf %78, %81 : vector<17x17xf32>
    %83 = vector.extract_strided_slice %82 {offsets = [0, 0], sizes = [1, 17], strides = [1, 1]} : vector<17x17xf32> to vector<1x17xf32>
    %cst_29 = arith.constant dense<0.000000e+00> : vector<17x8xf32>
    %84 = tpu.matmul %82, %72, %cst_29 {dimension_numbers = #tpu.dot_dimension_numbers<[1], [0], [0], [1], [0, 0, 1, 1], [], []>} : vector<17x17xf32>, vector<17x8xf32>, vector<17x8xf32> -> vector<17x8xf32>
    %85 = vector.extract_strided_slice %31 {offsets = [0, 24], sizes = [17, 8], strides = [1, 1]} : vector<17x32xf32> to vector<17x8xf32>
    %cst_30 = arith.constant 0.353553385 : f32
    %86 = vector.broadcast %cst_30 : f32 to vector<17x8xf32>
    %87 = arith.mulf %85, %86 : vector<17x8xf32>
    %88 = vector.extract_strided_slice %32 {offsets = [0, 24], sizes = [17, 8], strides = [1, 1]} : vector<17x32xf32> to vector<17x8xf32>
    %89 = vector.extract_strided_slice %33 {offsets = [0, 24], sizes = [17, 8], strides = [1, 1]} : vector<17x32xf32> to vector<17x8xf32>
    %cst_31 = arith.constant dense<0.000000e+00> : vector<17x17xf32>
    %90 = tpu.matmul %87, %88, %cst_31 {dimension_numbers = #tpu.dot_dimension_numbers<[1], [1], [0], [0], [0, 0, 1, 0], [], []>} : vector<17x8xf32>, vector<17x8xf32>, vector<17x17xf32> -> vector<17x17xf32>
    %cst_32 = arith.constant dense<0xFF800000> : vector<17xf32>
    %91 = vector.multi_reduction <maximumf>, %90, %cst_32 [1] : vector<17x17xf32> to vector<17xf32>
    %92 = vector.shape_cast %91 : vector<17xf32> to vector<17x1xf32>
    %93 = vector.broadcast %92 : vector<17x1xf32> to vector<17x17xf32>
    %94 = arith.subf %90, %93 : vector<17x17xf32>
    %95 = math.exp %94 : vector<17x17xf32>
    %cst_33 = arith.constant dense<0.000000e+00> : vector<17xf32>
    %96 = vector.multi_reduction <add>, %95, %cst_33 [1] : vector<17x17xf32> to vector<17xf32>
    %97 = vector.shape_cast %96 : vector<17xf32> to vector<17x1xf32>
    %98 = vector.broadcast %97 : vector<17x1xf32> to vector<17x17xf32>
    %99 = arith.divf %95, %98 : vector<17x17xf32>
    %100 = vector.extract_strided_slice %99 {offsets = [0, 0], sizes = [1, 17], strides = [1, 1]} : vector<17x17xf32> to vector<1x17xf32>
    %cst_34 = arith.constant dense<0.000000e+00> : vector<17x8xf32>
    %101 = tpu.matmul %99, %89, %cst_34 {dimension_numbers = #tpu.dot_dimension_numbers<[1], [0], [0], [1], [0, 0, 1, 1], [], []>} : vector<17x17xf32>, vector<17x8xf32>, vector<17x8xf32> -> vector<17x8xf32>
    %102 = tpu.concatenate %50, %67, %84, %101 in 1 : vector<17x8xf32>, vector<17x8xf32>, vector<17x8xf32>, vector<17x8xf32> -> vector<17x32xf32>
    %c0_35 = arith.constant 0 : index
    %c0_36 = arith.constant 0 : index
    %103 = vector.load %arg6[%c0_35, %c0_36] : memref<32x32xf32, #tpu.memory_space<vmem>>, vector<32x32xf32>
    %cst_37 = arith.constant dense<0.000000e+00> : vector<17x32xf32>
    %104 = tpu.matmul %102, %103, %cst_37 {dimension_numbers = #tpu.dot_dimension_numbers<[1], [0], [0], [1], [0, 0, 1, 1], [], []>} : vector<17x32xf32>, vector<32x32xf32>, vector<17x32xf32> -> vector<17x32xf32>
    %c0_38 = arith.constant 0 : index
    %c0_39 = arith.constant 0 : index
    %105 = vector.load %arg7[%c0_38, %c0_39] : memref<1x32xf32, #tpu.memory_space<vmem>>, vector<1x32xf32>
    %106 = vector.broadcast %105 : vector<1x32xf32> to vector<17x32xf32>
    %107 = arith.addf %104, %106 : vector<17x32xf32>
    %108 = arith.addf %1, %107 : vector<17x32xf32>
    %c0_40 = arith.constant 0 : index
    %c0_41 = arith.constant 0 : index
    %c0_42 = arith.constant 0 : index
    %109 = vector.load %arg8[%c0_40, %c0_41, %c0_42] : memref<1x17x32xf32, #tpu.memory_space<vmem>>, vector<1x17x32xf32>
    %110 = vector.shape_cast %109 : vector<1x17x32xf32> to vector<17x32xf32>
    %111 = vector.shape_cast %108 : vector<17x32xf32> to vector<1x17x32xf32>
    tpu.vector_store %arg8[%c0_40, %c0_41, %c0_42], %111 {strides = array<i32>} : memref<1x17x32xf32, #tpu.memory_space<vmem>>, vector<1x17x32xf32>,
    %112 = tpu.concatenate %49, %66, %83, %100 in 0 : vector<1x17xf32>, vector<1x17xf32>, vector<1x17xf32>, vector<1x17xf32> -> vector<4x17xf32>
    %c0_43 = arith.constant 0 : index
    %c0_44 = arith.constant 0 : index
    %c0_45 = arith.constant 0 : index
    %113 = vector.load %arg9[%c0_43, %c0_44, %c0_45] : memref<1x4x17xf32, #tpu.memory_space<vmem>>, vector<1x4x17xf32>
    %114 = vector.shape_cast %113 : vector<1x4x17xf32> to vector<4x17xf32>
    %115 = vector.shape_cast %112 : vector<4x17xf32> to vector<1x4x17xf32>
    tpu.vector_store %arg9[%c0_43, %c0_44, %c0_45], %115 {strides = array<i32>} : memref<1x4x17xf32, #tpu.memory_space<vmem>>, vector<1x4x17xf32>,
    return
  }
  func.func @transform_0(%arg0: i32) -> (i32, i32, i32) {
    %c0_i32 = arith.constant 0 : i32
    %c0_i32_0 = arith.constant 0 : i32
    %c0_i32_1 = arith.constant 0 : i32
    return %arg0, %c0_i32, %c0_i32_0 : i32, i32, i32
  }
  func.func @transform_1(%arg0: i32) -> (i32, i32) {
    %c0_i32 = arith.constant 0 : i32
    %c0_i32_0 = arith.constant 0 : i32
    %c0_i32_1 = arith.constant 0 : i32
    return %c0_i32, %c0_i32_0 : i32, i32
  }
  func.func @transform_2(%arg0: i32) -> (i32, i32) {
    %c0_i32 = arith.constant 0 : i32
    %c0_i32_0 = arith.constant 0 : i32
    %c0_i32_1 = arith.constant 0 : i32
    return %c0_i32, %c0_i32_0 : i32, i32
  }
  func.func @transform_3(%arg0: i32) -> (i32, i32) {
    %c0_i32 = arith.constant 0 : i32
    %c0_i32_0 = arith.constant 0 : i32
    %c0_i32_1 = arith.constant 0 : i32
    return %c0_i32, %c0_i32_0 : i32, i32
  }
  func.func @transform_4(%arg0: i32) -> (i32, i32) {
    %c0_i32 = arith.constant 0 : i32
    %c0_i32_0 = arith.constant 0 : i32
    %c0_i32_1 = arith.constant 0 : i32
    return %c0_i32, %c0_i32_0 : i32, i32
  }
  func.func @transform_5(%arg0: i32) -> (i32, i32) {
    %c0_i32 = arith.constant 0 : i32
    %c0_i32_0 = arith.constant 0 : i32
    %c0_i32_1 = arith.constant 0 : i32
    return %c0_i32, %c0_i32_0 : i32, i32
  }
  func.func @transform_6(%arg0: i32) -> (i32, i32) {
    %c0_i32 = arith.constant 0 : i32
    %c0_i32_0 = arith.constant 0 : i32
    %c0_i32_1 = arith.constant 0 : i32
    return %c0_i32, %c0_i32_0 : i32, i32
  }
  func.func @transform_7(%arg0: i32) -> (i32, i32, i32) {
    %c0_i32 = arith.constant 0 : i32
    %c0_i32_0 = arith.constant 0 : i32
    %c0_i32_1 = arith.constant 0 : i32
    return %arg0, %c0_i32, %c0_i32_0 : i32, i32, i32
  }
  func.func @transform_8(%arg0: i32) -> (i32, i32, i32) {
    %c0_i32 = arith.constant 0 : i32
    %c0_i32_0 = arith.constant 0 : i32
    %c0_i32_1 = arith.constant 0 : i32
    return %arg0, %c0_i32, %c0_i32_0 : i32, i32, i32
  }
}

</mosaic_0001>

<bundles_post_ra>
// kernel: tpu_custom_call.1
= control target key start
LH: loop header
LB: loop body
LE: loop exit
PB: predicated region body
PF: predicated region fallthrough
CT: control target
= control target key end

     0   :  { %s2732_s0 = inlined_call_operand.vmem [shape: f32[2,17,32], index: 0, kind: input, shape index: {}]   ;;  %s2733_s1 = inlined_call_operand.vmem [shape: f32[1,32], index: 1, kind: input, shape index: {}]   ;;  %s2734_s2 = inlined_call_operand.vmem [shape: f32[1,32], index: 2, kind: input, shape index: {}]   ;;  %s2735_s3 = inlined_call_operand.vmem [shape: f32[32,96], index: 3, kind: input, shape index: {}]   ;;  %s2736_s4 = inlined_call_operand.vmem [shape: f32[1,96], index: 4, kind: input, shape index: {}]   ;;  %s2737_s5 = inlined_call_operand.vmem [shape: f32[32,32], index: 5, kind: input, shape index: {}]   ;;  %s2738_s6 = inlined_call_operand.vmem [shape: f32[1,32], index: 6, kind: input, shape index: {}]   ;;  %s2739_s7 = inlined_call_operand.vmem [shape: f32[2,17,32], index: 7, kind: output, shape index: {0}]   ;;  %s2740_s8 = inlined_call_operand.hbm [shape: f32[2,4,17], index: 8, kind: output, shape index: {1}]  }
   0x1   :  { %2743 = sst [smem:[#allocation5_spill]] %s2732_s0 }
   0x2   :  { %2744 = sst [smem:[#allocation6_spill]] %s2733_s1 }
   0x3   :  { %14 = vsyncpa [#allocation3], 0 }
   0x4   :  { %16 = vsyncpa [#allocation3 + $0x1], 0  ;;  %s2303_s27 = smov 0   ;;  %s2305_s28 = smov 0  }
   0x5   :  { %s2307_s29 = smov 0   ;;  %s2309_s30 = smov 0  }
   0x6 LB: > { %s2324_s9 = sadd.s32 4294967295, %s2238_s30   ;;  %s1705_s10 = sadd.s32 4294967294, %s2238_s30   ;;  %s2238_s30 = sphi %s2309_s30, %s2756_s30   ;;  %s2234_s29 = sphi %s2307_s29, %s2755_s29   ;;  %s2230_s28 = sphi %s2305_s28, %s2754_s28   ;;  %s2226_s27 = sphi %s2303_s27, %s2753_s27  }
   0x7   : > { %s2328_s11 = sadd.s32 1, %s2238_s30   ;;  %s207_s12 = sadd.s32 1, %s2234_s29 }
   0x8   : > { %s204_s13 = ssub.s32 %s2238_s30, %s2328_s11  ;;  %p217_p0 = scmp.ne.s32.totalorder %s2234_s29, %s2230_s28 }
   0x9   : > { %p205_p1 = scmp.eq.s32.totalorder %s204_s13, 0  ;;  %p218_p2 = scmp.eq.s32.totalorder %s2324_s9, 1 }
   0xa   : > { %p223_p3 = scmp.ne.s32.totalorder %s2230_s28, %s2226_s27  ;;  %p224_p4 = scmp.eq.s32.totalorder %s1705_s10, 1 }
   0xb   : > { %s2339_s14 = scalar_select %p205_p1, %s2234_s29, %s207_s12  }
   0xc   : > { %p2341_p5 = por %p218_p2, %p217_p0  ;;  %p2345_p6 = por %p224_p4, %p223_p3 }
   0xd   : > { %p1708_p7 = scmp.ge.s32.totalorder %s2238_s30, 1  ;;  %p268_p8 = scmp.lt.s32.totalorder %s2238_s30, 3 }
   0xf   : > { %p269_p9 = pnand %p1708_p7, %p268_p8 }
  0x10   : > { %p307_p10 = scmp.lt.s32.totalorder (!%p269_p9), %s2324_s9, 1  ;;  %vm322_vm0 = vcmask (!%p269_p9), 261120   ;;  %vm329_vm1 = vcmask (!%p269_p9), 253952   ;;  %s2747_s0 = sld [smem:[#allocation5_spill]] (!%p269_p9)  ;;  %v382_v21 = vld [vmem:[%s2735_s3] sm:$0xff] (!%p269_p9)  ;;  %v383_v22 = vld [vmem:[%s2735_s3 + $0x8] sm:$0xff] (!%p269_p9) }
  0x11   : > { %272 = sbr.rel (%p269_p9) target bundleno = 1862 (0x746), region = 48  ;;  %v384_v23 = vld [vmem:[%s2735_s3 + $0x10] sm:$0xff] (!%p269_p9)  ;;  %v2240_v24 = vmov (!%p269_p9), 0.0|0.0   ;;  %v1983_v25 = vpack.c.bf16 (!%p269_p9), %v383_v22, %v382_v21  ;;  %v385_v26 = vld [vmem:[%s2735_s3 + $0x18] sm:$0xff] (!%p269_p9)  ;;  %vm2241_vm2 = vmmov (!%p269_p9), 0   ;;  %v2242_v27 = vmov (!%p269_p9), 0.0  }
  0x12   : > { %1982 = vmatprep.subr.bf16.mxu0 (!%p269_p9), %v2240_v24  ;;  %1836 = vmatprep.mubr.msk.f32.mxu0 (!%p269_p9), %vm2241_vm2, %v2242_v27  ;;  %v1986_v28 = vpack.c.bf16 (!%p269_p9), %v385_v26, %v384_v23  ;;  %s2748_s1 = sld [smem:[#allocation6_spill]] (!%p269_p9)  ;;  %v1713_v41 = vld [vmem:[%s2734_s2] ss:$0 sm:$0xff] (!%p269_p9)  ;;  %s2243_s26 = smov (!%p269_p9), 96   ;;  %vm494_vm3 = vcmask (!%p269_p9), 64512   ;;  %vm590_vm5 = vcmask (!%p269_p9), 138240  }
  0x13   : > { %1988 = vmatprep.subr.bf16.mxu1 (!%p269_p9), %v2240_v24  ;;  %1851 = vmatprep.mubr.msk.f32.mxu1 (!%p269_p9), %vm2241_vm2, %v2242_v27  ;;  %v1714_v54 = vld [vmem:[%s2736_s4] ss:$0 sm:$0xff] (!%p269_p9)  ;;  %s2244_s10 = smov (!%p269_p9), 80   ;;  %s2245_s12 = smov (!%p269_p9), 88   ;;  %vm2425_vm4 = vmpackc.low (!%p269_p9), %vm494_vm3, %vm494_vm3  ;;  %vm597_vm6 = vcmask (!%p269_p9), 131072   ;;  %vm642_vm7 = vcmask (!%p269_p9), 1040384  }
  0x14   : > { %1984 = vmatpush3.bf16.msra.mxu0 (!%p269_p9), %v1983_v25  ;;  %s2246_s13 = smov (!%p269_p9), 120   ;;  %s2247_s19 = smov (!%p269_p9), 112   ;;  %vm1593_vm8 = vcmask (!%p269_p9), 1041408   ;;  %vm1595_vm9 = vcmask (!%p269_p9), 1042432   ;;  %vm1597_vm10 = vcmask (!%p269_p9), 134144   ;;  %vm1472_vm11 = vcmask (!%p269_p9), 130048  }
  0x15   : > { %1985 = vmatprep.subr.bf16.mxu0 (!%p269_p9), %v2240_v24  ;;  %s2248_s20 = smov (!%p269_p9), 72   ;;  %s2249_s22 = smov (!%p269_p9), 104   ;;  %vm1476_vm12 = vcmask (!%p269_p9), 195584  }
  0x16   : > { %s2250_s23 = smov (!%p269_p9), 64   ;;  %s2251_s24 = smov (!%p269_p9), 56  }
  0x17   : > { %s2252_s25 = smov (!%p269_p9), 48  }
  0x18   : > { %s2353_s17 = scalar_select %p307_p10, %s2324_s9, 1  ;;  %1987 = vmatpush3.bf16.msra.mxu0 %v1986_v28  ;;  %v1712_v39 = vld [vmem:[%s2748_s1] ss:$0 sm:$0xff] }
  0x19   : > { %1992 = vmatprep.subr.bf16.mxu0 %v2240_v24 }
  0x1a   : > { %s2741_s18 = smul.u32 24, %s2353_s17 }
  0x1c   : > { %s2361_s21 = scalar_lea.vmem %s2747_s0, %s2741_s18  ;;  %s1763_s18 = sshll.u32 %s2324_s9, 6 }
  0x1d   : > { %v317_v0 = vld [vmem:[%s2361_s21] sm:$0xff]  ;;  %v319_v1 = vld [vmem:[%s2361_s21 + $0x10] sm:$0x1]  ;;  %v318_v2 = vld [vmem:[%s2361_s21 + $0x8] sm:$0xff] }
  0x1e   : > { %v323_v3 = vsel %vm322_vm0, %v317_v0, 0.0  ;;  %v330_v4 = vsel %vm329_vm1, %v319_v1, 0.0  ;;  %v326_v5 = vsel %vm322_vm0, %v318_v2, 0.0 }
  0x1f   : > { %324 = vadd.xlane.f32.xlu0 %v323_v3  ;;  %331 = vadd.xlane.f32.xlu1 %v330_v4 }
  0x23   : > { %327 = vadd.xlane.f32.xlu0 %v326_v5 }
  0xac   : > { %v325_v6 = vpop.xlane.xlu0 %324  ;;  %v332_v7 = vpop.xlane.xlu1 %331 }
  0xad   : > { %v334_v8 = vmul.f32 0.03125, %v325_v6  ;;  %v336_v9 = vmul.f32 0.03125, %v332_v7 }
  0xaf   : > { %v337_v10 = vsub.f32 %v317_v0, %v334_v8  ;;  %v339_v11 = vsub.f32 %v319_v1, %v336_v9 }
  0xb0   : > { %v328_v12 = vpop.xlane.xlu0 %327 }
  0xb1   : > { %v335_v13 = vmul.f32 0.03125, %v328_v12  ;;  %v340_v14 = vmul.f32 %v337_v10, %v337_v10  ;;  %v342_v15 = vmul.f32 %v339_v11, %v339_v11 }
  0xb3   : > { %v338_v16 = vsub.f32 %v318_v2, %v335_v13  ;;  %v343_v17 = vsel %vm322_vm0, %v340_v14, 0.0  ;;  %v349_v18 = vsel %vm329_vm1, %v342_v15, 0.0 }
  0xb4   : > { %344 = vadd.xlane.f32.xlu1 %v343_v17 }
  0xb5   : > { %v341_v19 = vmul.f32 %v338_v16, %v338_v16 }
  0xb7   : > { %v346_v20 = vsel %vm322_vm0, %v341_v19, 0.0 }
  0xb8   : > { %350 = vadd.xlane.f32.xlu1 %v349_v18  ;;  %347 = vadd.xlane.f32.xlu0 %v346_v20 }
 0x141   : > { %v345_v29 = vpop.xlane.xlu1 %344 }
 0x142   : > { %v352_v30 = vmul.f32 0.03125, %v345_v29 }
 0x144   : > { %v355_v31 = vadd.f32 1e-06, %v352_v30 }
 0x145   : > { %v351_v32 = vpop.xlane.xlu1 %350  ;;  %v348_v33 = vpop.xlane.xlu0 %347 }
 0x146   : > { %2119 = vrsqrt.f32 %v355_v31  ;;  %v354_v34 = vmul.f32 0.03125, %v351_v32  ;;  %v353_v35 = vmul.f32 0.03125, %v348_v33 }
 0x148   : > { %v357_v36 = vadd.f32 1e-06, %v354_v34  ;;  %v356_v37 = vadd.f32 1e-06, %v353_v35 }
 0x14a   : > { %2121 = vrsqrt.f32 %v357_v36 }
 0x14b   : > { %2123 = vrsqrt.f32 %v356_v37 }
 0x150   : > { %v2120_v38 = vpop.eup %2119 }
 0x151   : > { %v361_v40 = vmul.f32 %v2120_v38, %v337_v10 }
 0x153   : > { %v370_v42 = vmul.f32 %v1712_v39, %v361_v40 }
 0x154   : > { %v2122_v43 = vpop.eup %2121 }
 0x155   : > { %v2124_v44 = vpop.eup %2123  ;;  %v379_v45 = vadd.f32 %v1713_v41, %v370_v42  ;;  %v363_v47 = vmul.f32 %v2122_v43, %v339_v11 }
 0x156   : > { %v362_v46 = vmul.f32 %v2124_v44, %v338_v16 }
 0x157   : > { %1837 = vmatmul.mubr.msk.f32.vlgmr.msra.gmra.mrb[0].mxu0 %vm322_vm0, %v379_v45  ;;  %v372_v50 = vmul.f32 %v1712_v39, %v363_v47 }
 0x158   : > { %1839 = vmatprep.mubr.msk.f32.mxu0 %vm2241_vm2, %v2242_v27  ;;  %v371_v48 = vmul.f32 %v1712_v39, %v362_v46 }
 0x159   : > { %v381_v51 = vadd.f32 %v1713_v41, %v372_v50 }
 0x15a   : > { %v380_v49 = vadd.f32 %v1713_v41, %v371_v48 }
 0x15c   : > { %1840 = vmatmul.mubr.msk.f32.gmra.mrb[2].mxu0 %vm322_vm0, %v380_v49 }
 0x15d   : > { %1842 = vmatprep.mubr.msk.f32.mxu0 %vm2241_vm2, %v2242_v27 }
 0x160   : > { %1843 = vmatmul.mubr.msk.f32.gmra.mrb[4].mxu0 %vm322_vm0, %v381_v51 }
 0x161   : > { %1866 = vmatprep.mubr.msk.f32.mxu0 %vm2241_vm2, %v2242_v27 }
 0x22a   : > { %v468_v52 = vpop.f32.mrb[0].mxu0 }
 0x22b   : > { %v1838_v53 = vpop.f32.mrb[1].mxu0  ;;  %v469_v56 = vadd.f32 %v1714_v54, %v468_v52 }
 0x22d   : > { %v482_v0 = vmul.f32 0.35355338, %v469_v56 }
 0x22f   : > { %v473_v55 = vpop.f32.mrb[2].mxu0 }
 0x230   : > { %v474_v57 = vadd.f32 %v1714_v54, %v473_v55  ;;  %v1841_v58 = vpop.f32.mrb[3].mxu0 }
 0x232   : > { %v2410_v59 = vpack.i.bf16 %v474_v57, %v469_v56  ;;  %v483_v63 = vmul.f32 0.35355338, %v474_v57 }
 0x233   : > { %v478_v60 = vpop.f32.mrb[4].mxu0 }
 0x234   : > { %v2412_v61 = vadd.f32 %v1714_v54, %v478_v60  ;;  %2080 = vrot.lane.b32.xlu0 %v2410_v59, %s2243_s26  ;;  %v1844_v62 = vpop.f32.mrb[5].mxu0 }
 0x236   : > { %492 = vrot.lane.b32.xlu1 %v2412_v61, %s2243_s26  ;;  %v484_v1 = vmul.f32 0.35355338, %v2412_v61  ;;  %s2253_s26 = smov 40  }
 0x238   : > { %2090 = vrot.lane.b32.xlu0 %v2410_v59, %s2244_s10 }
 0x23a   : > { %2085 = vrot.lane.b32.xlu1 %v2410_v59, %s2245_s12 }
 0x23c   : > { %727 = vrot.lane.b32.xlu0 %v483_v63, %s2246_s13 }
 0x23e   : > { %735 = vrot.lane.b32.xlu1 %v2412_v61, %s2245_s12 }
 0x240   : > { %971 = vrot.lane.b32.xlu0 %v2412_v61, %s2244_s10  ;;  %s2742_s10 = sand.u32 1, %s2230_s28  }
 0x241   : > { %s2610_s12 = sshll.u32 %s2742_s10, 2 }
 0x242   : > { %725 = vrot.lane.b32.xlu1 %v482_v0, %s2246_s13 }
 0x244   : > { %961 = vrot.lane.b32.xlu0 %v482_v0, %s2247_s19 }
 0x246   : > { %729 = vrot.lane.b32.xlu1 %v484_v1, %s2246_s13  ;;  %s306_s13 = scalar_lea.vmem [#allocation2], %s2610_s12 }
 0x248   : > { %965 = vrot.lane.b32.xlu0 %v484_v1, %s2247_s19 }
 0x24a   : > { %2095 = vrot.lane.b32.xlu1 %v2410_v59, %s2248_s20 }
 0x24c   : > { %1197 = vrot.lane.b32.xlu0 %v482_v0, %s2249_s22 }
 0x24e   : > { %963 = vrot.lane.b32.xlu1 %v483_v63, %s2247_s19  ;;  %s2254_s19 = smov 8  }
 0x250   : > { %1201 = vrot.lane.b32.xlu0 %v484_v1, %s2249_s22 }
 0x252   : > { %1207 = vrot.lane.b32.xlu1 %v2412_v61, %s2248_s20  ;;  %s2256_s20 = smov 24  }
 0x256   : > { %1199 = vrot.lane.b32.xlu1 %v483_v63, %s2249_s22 }
 0x2a6   : > { %v2081_v2 = vpop.permute.xlu0 %2080 }
 0x2a7   : > { %v2083_v3 = vunpack.i.h.bf16 %v2081_v2  ;;  %v2082_v4 = vunpack.i.l.bf16 %v2081_v2 }
 0x2a8   : > { %v493_v5 = vpop.permute.xlu1 %492 }
 0x2a9   : > { %v1989_v7 = vpack.c.bf16 %v2083_v3, %v2082_v4 }
 0x2aa   : > { %v2091_v13 = vpop.permute.xlu0 %2090 }
 0x2ab   : > { %1991 = vmatpush3.bf16.xpose.msk.msra.mxu1 %vm2425_vm4, %v1989_v7  ;;  %v2093_v15 = vunpack.i.h.bf16 %v2091_v13  ;;  %v2092_v16 = vunpack.i.l.bf16 %v2091_v13 }
 0x2ac   : > { %1849 = vmatprep.subr.mxu1 %v2242_v27  ;;  %v2086_v8 = vpop.permute.xlu1 %2085 }
 0x2ad   : > { %v2088_v9 = vunpack.i.h.bf16 %v2086_v8  ;;  %v2087_v10 = vunpack.i.l.bf16 %v2086_v8  ;;  %v2003_v18 = vpack.c.bf16 %v2093_v15, %v2092_v16 }
 0x2ae   : > { %v728_v19 = vpop.permute.xlu0 %727 }
 0x2af   : > { %v1996_v12 = vpack.c.bf16 %v2088_v9, %v2087_v10 }
 0x2b0   : > { %v736_v11 = vpop.permute.xlu1 %735 }
 0x2b2   : > { %v972_v21 = vpop.permute.xlu0 %971 }
 0x2b3   : > { %1850 = vmatpush3.xpose.msk.msra.mxu1 %vm494_vm3, %v493_v5 }
 0x2b4   : > { %1995 = vmatprep.subr.bf16.mxu1 %v2240_v24  ;;  %v726_v14 = vpop.permute.xlu1 %725 }
 0x2b6   : > { %1852 = vmatmul.mubr.msk.f32.vlgmr.msra.gmra.mrb[0].mxu1 %vm494_vm3, %v482_v0  ;;  %v962_v25 = vpop.permute.xlu0 %961 }
 0x2b7   : > { %1998 = vmatpush3.bf16.xpose.msk.msra.mxu1 %vm2425_vm4, %v1996_v12  ;;  %1854 = vmatprep.mubr.msk.f32.mxu1 %vm2241_vm2, %v2242_v27 }
 0x2b8   : > { %1879 = vmatprep.subr.mxu1 %v2242_v27  ;;  %v730_v17 = vpop.permute.xlu1 %729 }
 0x2ba   : > { %1855 = vmatmul.mubr.msk.f32.gmra.mrb[2].mxu1 %vm494_vm3, %v483_v63  ;;  %v966_v29 = vpop.permute.xlu0 %965 }
 0x2bb   : > { %1857 = vmatprep.mubr.msk.f32.mxu1 %vm2241_vm2, %v2242_v27 }
 0x2bc   : > { %v2096_v20 = vpop.permute.xlu1 %2095 }
 0x2bd   : > { %v2098_v22 = vunpack.i.h.bf16 %v2096_v20  ;;  %v2097_v23 = vunpack.i.l.bf16 %v2096_v20 }
 0x2be   : > { %1858 = vmatmul.mubr.msk.f32.gmra.mrb[4].mxu1 %vm494_vm3, %v484_v1  ;;  %v1198_v31 = vpop.permute.xlu0 %1197 }
 0x2bf   : > { %1880 = vmatpush3.xpose.msk.msra.mxu1 %vm494_vm3, %v736_v11  ;;  %1881 = vmatprep.mubr.msk.f32.mxu1 %vm2241_vm2, %v2242_v27  ;;  %v2010_v26 = vpack.c.bf16 %v2098_v22, %v2097_v23 }
 0x2c0   : > { %2002 = vmatprep.subr.bf16.mxu1 %v2240_v24  ;;  %v964_v28 = vpop.permute.xlu1 %963 }
 0x2c2   : > { %1882 = vmatmul.mubr.msk.f32.vlgmr.msra.gmra.mrb[6].mxu1 %vm494_vm3, %v726_v14  ;;  %v1202_v33 = vpop.permute.xlu0 %1201 }
 0x2c3   : > { %2005 = vmatpush3.bf16.xpose.msk.msra.mxu1 %vm2425_vm4, %v2003_v18  ;;  %1884 = vmatprep.mubr.msk.f32.mxu1 %vm2241_vm2, %v2242_v27 }
 0x2c4   : > { %1909 = vmatprep.subr.mxu1 %v2242_v27  ;;  %v1208_v30 = vpop.permute.xlu1 %1207 }
 0x2c6   : > { %1885 = vmatmul.mubr.msk.f32.gmra.mrb[8].mxu1 %vm494_vm3, %v728_v19 }
 0x2c7   : > { %1887 = vmatprep.mubr.msk.f32.mxu1 %vm2241_vm2, %v2242_v27 }
 0x2c8   : > { %v1200_v32 = vpop.permute.xlu1 %1199 }
 0x2ca   : > { %1888 = vmatmul.mubr.msk.f32.gmra.mrb[10].mxu1 %vm494_vm3, %v730_v17 }
 0x2cb   : > { %1910 = vmatpush3.xpose.msk.msra.mxu1 %vm494_vm3, %v972_v21  ;;  %1911 = vmatprep.mubr.msk.f32.mxu1 %vm2241_vm2, %v2242_v27 }
 0x2cc   : > { %2009 = vmatprep.subr.bf16.mxu1 %v2240_v24 }
 0x2ce   : > { %1912 = vmatmul.mubr.msk.f32.vlgmr.msra.gmra.mrb[12].mxu1 %vm494_vm3, %v962_v25 }
 0x2cf   : > { %2012 = vmatpush3.bf16.xpose.msk.msra.mxu1 %vm2425_vm4, %v2010_v26  ;;  %1914 = vmatprep.mubr.msk.f32.mxu1 %vm2241_vm2, %v2242_v27 }
 0x2d0   : > { %1939 = vmatprep.subr.mxu1 %v2242_v27 }
 0x2d2   : > { %1915 = vmatmul.mubr.msk.f32.gmra.mrb[14].mxu1 %vm494_vm3, %v964_v28 }
 0x2d3   : > { %1917 = vmatprep.mubr.msk.f32.mxu1 %vm2241_vm2, %v2242_v27 }
 0x2d6   : > { %1918 = vmatmul.mubr.msk.f32.gmra.mrb[16].mxu1 %vm494_vm3, %v966_v29 }
 0x2d7   : > { %1940 = vmatpush3.xpose.msk.msra.mxu1 %vm494_vm3, %v1208_v30  ;;  %1941 = vmatprep.mubr.msk.f32.mxu1 %vm2241_vm2, %v2242_v27 }
 0x2d8   : > { %2016 = vmatprep.subr.bf16.mxu1 %v2240_v24 }
 0x2da   : > { %1942 = vmatmul.mubr.msk.f32.vlgmr.msra.gmra.mrb[18].mxu1 %vm494_vm3, %v1198_v31 }
 0x2db   : > { %1944 = vmatprep.mubr.msk.f32.mxu1 %vm2241_vm2, %v2242_v27 }
 0x2de   : > { %1945 = vmatmul.mubr.msk.f32.gmra.mrb[20].mxu1 %vm494_vm3, %v1200_v32 }
 0x2df   : > { %1947 = vmatprep.mubr.msk.f32.mxu1 %vm2241_vm2, %v2242_v27 }
 0x2e2   : > { %1948 = vmatmul.mubr.msk.f32.gmra.mrb[22].mxu1 %vm494_vm3, %v1202_v33 }
 0x2e3   : > { %1973 = vmatprep.mubr.msk.f32.mxu1 %vm2241_vm2, %v2242_v27 }
 0x389   : > { %v576_v34 = vpop.f32.mrb[0].mxu1 }
 0x38a   : > { %v1853_v35 = vpop.f32.mrb[1].mxu1  ;;  %v591_v36 = vsel %vm590_vm5, %v576_v34, -inf }
 0x38b   : > { %592 = vmax.xlane.f32.xlu1 %v591_v36 }
 0x38d   : > { %v581_v37 = vpop.f32.mrb[2].mxu1 }
 0x38e   : > { %v1856_v38 = vpop.f32.mrb[3].mxu1  ;;  %v594_v39 = vsel %vm590_vm5, %v581_v37, -inf }
 0x38f   : > { %595 = vmax.xlane.f32.xlu0 %v594_v39 }
 0x391   : > { %v586_v40 = vpop.f32.mrb[4].mxu1 }
 0x392   : > { %v1859_v41 = vpop.f32.mrb[5].mxu1  ;;  %v598_v42 = vsel %vm597_vm6, %v586_v40, -inf }
 0x393   : > { %599 = vmax.xlane.f32.xlu0 %v598_v42 }
 0x395   : > { %v815_v43 = vpop.f32.mrb[6].mxu1 }
 0x396   : > { %v1883_v44 = vpop.f32.mrb[7].mxu1  ;;  %v829_v45 = vsel %vm590_vm5, %v815_v43, -inf }
 0x397   : > { %830 = vmax.xlane.f32.xlu0 %v829_v45 }
 0x399   : > { %v820_v46 = vpop.f32.mrb[8].mxu1 }
 0x39a   : > { %v1886_v47 = vpop.f32.mrb[9].mxu1  ;;  %v832_v48 = vsel %vm590_vm5, %v820_v46, -inf }
 0x39b   : > { %833 = vmax.xlane.f32.xlu1 %v832_v48 }
 0x39d   : > { %v825_v49 = vpop.f32.mrb[10].mxu1 }
 0x39e   : > { %v1889_v50 = vpop.f32.mrb[11].mxu1  ;;  %v835_v51 = vsel %vm597_vm6, %v825_v49, -inf }
 0x39f   : > { %836 = vmax.xlane.f32.xlu0 %v835_v51 }
 0x3a1   : > { %v2491_v52 = vpop.f32.mrb[12].mxu1 }
 0x3a2   : > { %v1913_v53 = vpop.f32.mrb[13].mxu1  ;;  %v1065_v54 = vsel %vm590_vm5, %v2491_v52, -inf }
 0x3a3   : > { %1066 = vmax.xlane.f32.xlu1 %v1065_v54 }
 0x3a5   : > { %v2495_v55 = vpop.f32.mrb[14].mxu1 }
 0x3a6   : > { %v1916_v56 = vpop.f32.mrb[15].mxu1  ;;  %v1068_v57 = vsel %vm590_vm5, %v2495_v55, -inf }
 0x3a7   : > { %1069 = vmax.xlane.f32.xlu0 %v1068_v57 }
 0x3a9   : > { %v2499_v58 = vpop.f32.mrb[16].mxu1 }
 0x3aa   : > { %v1919_v60 = vpop.f32.mrb[17].mxu1  ;;  %v1071_v62 = vsel %vm597_vm6, %v2499_v58, -inf }
 0x3ab   : > { %1072 = vmax.xlane.f32.xlu1 %v1071_v62 }
 0x3ad   : > { %v2503_v63 = vpop.f32.mrb[18].mxu1 }
 0x3ae   : > { %v1943_v0 = vpop.f32.mrb[19].mxu1  ;;  %v1301_v1 = vsel %vm590_vm5, %v2503_v63, -inf }
 0x3af   : > { %1302 = vmax.xlane.f32.xlu0 %v1301_v1 }
 0x3b1   : > { %v2507_v2 = vpop.f32.mrb[20].mxu1 }
 0x3b2   : > { %v1946_v3 = vpop.f32.mrb[21].mxu1  ;;  %v1304_v4 = vsel %vm590_vm5, %v2507_v2, -inf }
 0x3b3   : > { %1305 = vmax.xlane.f32.xlu1 %v1304_v4 }
 0x3b5   : > { %v2511_v5 = vpop.f32.mrb[22].mxu1 }
 0x3b6   : > { %v1949_v6 = vpop.f32.mrb[23].mxu1  ;;  %v1307_v7 = vsel %vm597_vm6, %v2511_v5, -inf }
 0x3b7   : > { %1308 = vmax.xlane.f32.xlu0 %v1307_v7 }
 0x3c4   : > { %629 = vrot.lane.b32.xlu1 %v2412_v61, %s2250_s23 }
 0x3c8   : > { %2105 = vrot.lane.b32.xlu1 %v2410_v59, %s2251_s24 }
 0x3cd   : > { %2100 = vrot.lane.b32.xlu0 %v2410_v59, %s2250_s23  ;;  %s2678_s23 = scalar_lea.hbm %s2740_s8, %s1763_s18 }
 0x418   : > { %v593_v8 = vpop.xlane.xlu1 %592 }
 0x419   : > { %v601_v9 = vsub.f32 %v576_v34, %v593_v8 }
 0x41b   : > { %v604_v10 = vmul.f32 1.442695, %v601_v9 }
 0x41c   : > { %v596_v11 = vpop.xlane.xlu0 %595 }
 0x41d   : > { %2125 = vpow2.f32 %v604_v10  ;;  %v602_v12 = vsub.f32 %v581_v37, %v596_v11 }
 0x41f   : > { %v606_v13 = vmul.f32 1.442695, %v602_v12 }
 0x420   : > { %v600_v14 = vpop.xlane.xlu0 %599 }
 0x421   : > { %2127 = vpow2.f32 %v606_v13  ;;  %v603_v15 = vsub.f32 %v586_v40, %v600_v14 }
 0x423   : > { %v608_v16 = vmul.f32 1.442695, %v603_v15 }
 0x424   : > { %v831_v17 = vpop.xlane.xlu0 %830 }
 0x425   : > { %2129 = vpow2.f32 %v608_v16  ;;  %v838_v18 = vsub.f32 %v815_v43, %v831_v17 }
 0x427   : > { %v2519_v19 = vpop.eup %2125  ;;  %v841_v20 = vmul.f32 1.442695, %v838_v18 }
 0x428   : > { %v834_v21 = vpop.xlane.xlu1 %833  ;;  %v610_v22 = vsel %vm590_vm5, %v2519_v19, 0.0 }
 0x429   : > { %2131 = vpow2.f32 %v841_v20  ;;  %v839_v23 = vsub.f32 %v820_v46, %v834_v21  ;;  %611 = vadd.xlane.f32.xlu1 %v610_v22 }
 0x42b   : > { %v2523_v25 = vpop.eup %2127  ;;  %v843_v26 = vmul.f32 1.442695, %v839_v23 }
 0x42c   : > { %v837_v28 = vpop.xlane.xlu0 %836  ;;  %v613_v29 = vsel %vm590_vm5, %v2523_v25, 0.0 }
 0x42d   : > { %2133 = vpow2.f32 %v843_v26  ;;  %v840_v30 = vsub.f32 %v825_v49, %v837_v28  ;;  %614 = vadd.xlane.f32.xlu0 %v613_v29 }
 0x42f   : > { %v2527_v31 = vpop.eup %2129  ;;  %v845_v32 = vmul.f32 1.442695, %v840_v30 }
 0x430   : > { %v1067_v33 = vpop.xlane.xlu1 %1066  ;;  %v616_v34 = vsel %vm597_vm6, %v2527_v31, 0.0 }
 0x431   : > { %2135 = vpow2.f32 %v845_v32  ;;  %v1074_v35 = vsub.f32 %v2491_v52, %v1067_v33  ;;  %617 = vadd.xlane.f32.xlu1 %v616_v34 }
 0x433   : > { %v2532_v36 = vpop.eup %2131  ;;  %v1077_v37 = vmul.f32 1.442695, %v1074_v35 }
 0x434   : > { %v1070_v38 = vpop.xlane.xlu0 %1069  ;;  %v847_v39 = vsel %vm590_vm5, %v2532_v36, 0.0 }
 0x435   : > { %2137 = vpow2.f32 %v1077_v37  ;;  %v1075_v40 = vsub.f32 %v2495_v55, %v1070_v38  ;;  %848 = vadd.xlane.f32.xlu0 %v847_v39 }
 0x437   : > { %v2537_v41 = vpop.eup %2133  ;;  %v1079_v42 = vmul.f32 1.442695, %v1075_v40 }
 0x438   : > { %v1073_v43 = vpop.xlane.xlu1 %1072  ;;  %v850_v44 = vsel %vm590_vm5, %v2537_v41, 0.0 }
 0x439   : > { %2139 = vpow2.f32 %v1079_v42  ;;  %v1076_v45 = vsub.f32 %v2499_v58, %v1073_v43  ;;  %851 = vadd.xlane.f32.xlu1 %v850_v44 }
 0x43b   : > { %v2542_v46 = vpop.eup %2135  ;;  %v1081_v47 = vmul.f32 1.442695, %v1076_v45 }
 0x43c   : > { %v1303_v48 = vpop.xlane.xlu0 %1302  ;;  %v853_v49 = vsel %vm597_vm6, %v2542_v46, 0.0 }
 0x43d   : > { %2141 = vpow2.f32 %v1081_v47  ;;  %v1310_v50 = vsub.f32 %v2503_v63, %v1303_v48  ;;  %854 = vadd.xlane.f32.xlu1 %v853_v49 }
 0x43f   : > { %v2547_v51 = vpop.eup %2137  ;;  %v1313_v52 = vmul.f32 1.442695, %v1310_v50 }
 0x440   : > { %v1083_v53 = vsel %vm590_vm5, %v2547_v51, 0.0  ;;  %v1306_v1 = vpop.xlane.xlu1 %1305 }
 0x441   : > { %2143 = vpow2.f32 %v1313_v52  ;;  %1084 = vadd.xlane.f32.xlu1 %v1083_v53  ;;  %v1311_v7 = vsub.f32 %v2507_v2, %v1306_v1 }
 0x443   : > { %v2551_v54 = vpop.eup %2139  ;;  %v1315_v8 = vmul.f32 1.442695, %v1311_v7 }
 0x444   : > { %v1309_v55 = vpop.xlane.xlu0 %1308  ;;  %v1086_v56 = vsel %vm590_vm5, %v2551_v54, 0.0  ;;  %v630_v6 = vpop.permute.xlu1 %629 }
 0x445   : > { %1087 = vadd.xlane.f32.xlu0 %v1086_v56  ;;  %v1312_v9 = vsub.f32 %v2511_v5, %v1309_v55  ;;  %2145 = vpow2.f32 %v1315_v8 }
 0x447   : > { %v2555_v57 = vpop.eup %2141  ;;  %v1317_v10 = vmul.f32 1.442695, %v1312_v9 }
 0x448   : > { %v2101_v58 = vpop.permute.xlu0 %2100  ;;  %v1089_v60 = vsel %vm597_vm6, %v2555_v57, 0.0  ;;  %v2106_v2 = vpop.permute.xlu1 %2105 }
 0x449   : > { %v2103_v62 = vunpack.i.h.bf16 %v2101_v58  ;;  %1090 = vadd.xlane.f32.xlu1 %v1089_v60  ;;  %v2102_v63 = vunpack.i.l.bf16 %v2101_v58  ;;  %2147 = vpow2.f32 %v1317_v10  ;;  %v2108_v17 = vunpack.i.h.bf16 %v2106_v2 }
 0x44a   : > { %v2107_v18 = vunpack.i.l.bf16 %v2106_v2 }
 0x44b   : > { %v2559_v0 = vpop.eup %2143  ;;  %v1993_v3 = vpack.c.bf16 %v2103_v62, %v2102_v63 }
 0x44c   : > { %v1319_v4 = vsel %vm590_vm5, %v2559_v0, 0.0  ;;  %v2000_v22 = vpack.c.bf16 %v2108_v17, %v2107_v18 }
 0x44d   : > { %1320 = vadd.xlane.f32.xlu0 %v1319_v4  ;;  %1994 = vmatpush3.bf16.msra.mxu0 %v1993_v3 }
 0x44e   : > { %1864 = vmatprep.subr.mxu0 %v2242_v27 }
 0x44f   : > { %v2571_v11 = vpop.eup %2145 }
 0x450   : > { %v1322_v12 = vsel %vm590_vm5, %v2571_v11, 0.0 }
 0x451   : > { %1865 = vmatpush3.msk.msra.mxu0 %vm642_vm7, %v630_v6 }
 0x452   : > { %1999 = vmatprep.subr.bf16.mxu0 %v2240_v24 }
 0x453   : > { %v2575_v13 = vpop.eup %2147 }
 0x454   : > { %v1325_v14 = vsel %vm597_vm6, %v2575_v13, 0.0 }
 0x45a   : > { %2110 = vrot.lane.b32.xlu1 %v2410_v59, %s2252_s25 }
 0x463   : > { %866 = vrot.lane.b32.xlu0 %v2412_v61, %s2251_s24  ;;  %s1621_s24 = sshll.u32 %s306_s13, 4  ;;  %s1622_s24 = int_to_ptr.vmem [resolvable:$true] %s1621_s24 }
 0x47e   : > { %1323 = vadd.xlane.f32.xlu1 %v1322_v12 }
 0x482   : > { %1326 = vadd.xlane.f32.xlu0 %v1325_v14 }
 0x48f   : > { %1102 = vrot.lane.b32.xlu1 %v2412_v61, %s2252_s25  ;;  %s2751_s25 = sand.u32 1, %s2230_s28  }
 0x493   : > { %2115 = vrot.lane.b32.xlu1 %v2410_v59, %s2253_s26 }
 0x497   : > { %1338 = vrot.lane.b32.xlu1 %v2412_v61, %s2253_s26  ;;  %s1605_s26 = scalar_lea.sflag [#allocation3], %s2751_s25 }
 0x4b6   : > { %v612_v5 = vpop.xlane.xlu1 %611 }
 0x4b7   : > { %2149 = vrcp.f32 %v612_v5 }
 0x4ba   : > { %v615_v15 = vpop.xlane.xlu0 %614 }
 0x4bb   : > { %2151 = vrcp.f32 %v615_v15 }
 0x4be   : > { %v618_v16 = vpop.xlane.xlu1 %617 }
 0x4bf   : > { %2153 = vrcp.f32 %v618_v16 }
 0x4c1   : > { %v2150_v20 = vpop.eup %2149 }
 0x4c2   : > { %v620_v21 = vmul.f32 %v2150_v20, %v2519_v19  ;;  %v849_v29 = vpop.xlane.xlu0 %848 }
 0x4c3   : > { %2155 = vrcp.f32 %v849_v29 }
 0x4c4   : > { %1867 = vmatmul.mubr.msk.f32.vlgmr.msra.gmra.mrb[6].mxu0 %vm590_vm5, %v620_v21 }
 0x4c5   : > { %v2152_v23 = vpop.eup %2151  ;;  %2001 = vmatpush3.bf16.msra.mxu0 %v2000_v22  ;;  %1869 = vmatprep.mubr.msk.f32.mxu0 %vm2241_vm2, %v2242_v27  ;;  %v1481_v22 = vld [vmem:[%s2737_s5 + $0x8] sm:$0xff] }
 0x4c6   : > { %v852_v59 = vpop.xlane.xlu1 %851  ;;  %v622_v61 = vmul.f32 %v2152_v23, %v2523_v25  ;;  %1894 = vmatprep.subr.mxu0 %v2242_v27 }
 0x4c8   : > { %1870 = vmatmul.mubr.msk.f32.gmra.mrb[8].mxu0 %vm590_vm5, %v622_v61  ;;  %v1483_v61 = vld [vmem:[%s2737_s5 + $0x18] sm:$0xff] }
 0x4c9   : > { %v2154_v26 = vpop.eup %2153  ;;  %1872 = vmatprep.mubr.msk.f32.mxu0 %vm2241_vm2, %v2242_v27 }
 0x4ca   : > { %v624_v19 = vmul.f32 %v2154_v26, %v2527_v31  ;;  %v855_v28 = vpop.xlane.xlu1 %854 }
 0x4cc   : > { %1873 = vmatmul.mubr.msk.f32.gmra.mrb[10].mxu0 %vm590_vm5, %v624_v19 }
 0x4cd   : > { %1896 = vmatprep.mubr.msk.f32.mxu0 %vm2241_vm2, %v2242_v27  ;;  %v2156_v35 = vpop.eup %2155 }
 0x4ce   : > { %v1085_v30 = vpop.xlane.xlu1 %1084  ;;  %v857_v39 = vmul.f32 %v2156_v35, %v2532_v36 }
 0x4cf   : > { %2157 = vrcp.f32 %v1085_v30 }
 0x4d0   : > { %2159 = vrcp.f32 %v852_v59  ;;  %v1586_v47 = vrot.slane %v857_v39, 7  ;;  %v1482_v59 = vld [vmem:[%s2737_s5 + $0x10] sm:$0xff] }
 0x4d1   : > { %2161 = vrcp.f32 %v855_v28  ;;  %v2020_v26 = vpack.c.bf16 %v1483_v61, %v1482_v59 }
 0x4d2   : > { %v1088_v25 = vpop.xlane.xlu0 %1087  ;;  %v1592_v52 = vsel %vm642_vm7, %v620_v21, %v1586_v47 }
 0x4d6   : > { %v1091_v32 = vpop.xlane.xlu1 %1090 }
 0x4d9   : > { %v2158_v38 = vpop.eup %2157 }
 0x4da   : > { %v2111_v33 = vpop.permute.xlu1 %2110  ;;  %v1321_v34 = vpop.xlane.xlu0 %1320  ;;  %v1093_v44 = vmul.f32 %v2158_v38, %v2547_v51 }
 0x4db   : > { %v2113_v37 = vunpack.i.h.bf16 %v2111_v33  ;;  %v2112_v31 = vunpack.i.l.bf16 %v2111_v33  ;;  %2163 = vrcp.f32 %v1321_v34  ;;  %v2160_v42 = vpop.eup %2159 }
 0x4dc   : > { %v859_v45 = vmul.f32 %v2160_v42, %v2537_v41  ;;  %v2162_v36 = vpop.eup %2161  ;;  %v1588_v49 = vrot.slane %v1093_v44, 6  ;;  %2165 = vrcp.f32 %v1088_v25 }
 0x4dd   : > { %v2007_v43 = vpack.c.bf16 %v2113_v37, %v2112_v31  ;;  %v861_v41 = vmul.f32 %v2162_v36, %v2542_v46  ;;  %2167 = vrcp.f32 %v1091_v32 }
 0x4de   : > { %v867_v40 = vpop.permute.xlu0 %866  ;;  %v1594_v53 = vsel %vm1593_vm8, %v1592_v52, %v1588_v49 }
 0x4df   : > { %1895 = vmatpush3.msk.msra.mxu0 %vm642_vm7, %v867_v40 }
 0x4e0   : > { %1897 = vmatmul.mubr.msk.f32.vlgmr.msra.gmra.mrb[12].mxu0 %vm590_vm5, %v857_v39  ;;  %2006 = vmatprep.subr.bf16.mxu0 %v2240_v24 }
 0x4e1   : > { %2008 = vmatpush3.bf16.msra.mxu0 %v2007_v43  ;;  %1899 = vmatprep.mubr.msk.f32.mxu0 %vm2241_vm2, %v2242_v27 }
 0x4e2   : > { %1924 = vmatprep.subr.mxu0 %v2242_v27 }
 0x4e4   : > { %1900 = vmatmul.mubr.msk.f32.gmra.mrb[14].mxu0 %vm590_vm5, %v859_v45 }
 0x4e5   : > { %v2164_v48 = vpop.eup %2163  ;;  %1902 = vmatprep.mubr.msk.f32.mxu0 %vm2241_vm2, %v2242_v27 }
 0x4e6   : > { %v1329_v50 = vmul.f32 %v2164_v48, %v2559_v0  ;;  %v2166_v58 = vpop.eup %2165 }
 0x4e7   : > { %v1095_v63 = vmul.f32 %v2166_v58, %v2551_v54  ;;  %v2168_v0 = vpop.eup %2167 }
 0x4e8   : > { %1903 = vmatmul.mubr.msk.f32.gmra.mrb[16].mxu0 %vm590_vm5, %v861_v41  ;;  %v1590_v51 = vrot.slane %v1329_v50, 5  ;;  %v1097_v6 = vmul.f32 %v2168_v0, %v2555_v57 }
 0x4e9   : > { %1926 = vmatprep.mubr.msk.f32.mxu0 %vm2241_vm2, %v2242_v27 }
 0x4ea   : > { %v1596_v55 = vsel %vm1595_vm9, %v1594_v53, %v1590_v51 }
 0x4eb   : > { %1598 = vst.msk [vmem:[%s306_s13] sm:$0xf] %vm1597_vm10, %v1596_v55 }
 0x50b   : > { %v1324_v56 = vpop.xlane.xlu1 %1323 }
 0x50c   : > { %2169 = vrcp.f32 %v1324_v56 }
 0x50f   : > { %v1103_v46 = vpop.permute.xlu1 %1102  ;;  %v1327_v60 = vpop.xlane.xlu0 %1326 }
 0x510   : > { %1925 = vmatpush3.msk.msra.mxu0 %vm642_vm7, %v1103_v46  ;;  %2171 = vrcp.f32 %v1327_v60 }
 0x511   : > { %1927 = vmatmul.mubr.msk.f32.vlgmr.msra.gmra.mrb[18].mxu0 %vm590_vm5, %v1093_v44  ;;  %2013 = vmatprep.subr.bf16.mxu0 %v2240_v24 }
 0x512   : > { %1929 = vmatprep.mubr.msk.f32.mxu0 %vm2241_vm2, %v2242_v27 }
 0x513   : > { %v2116_v62 = vpop.permute.xlu1 %2115 }
 0x514   : > { %v2118_v1 = vunpack.i.h.bf16 %v2116_v62  ;;  %v2117_v3 = vunpack.i.l.bf16 %v2116_v62 }
 0x515   : > { %1930 = vmatmul.mubr.msk.f32.gmra.mrb[20].mxu0 %vm590_vm5, %v1095_v63 }
 0x516   : > { %v2014_v4 = vpack.c.bf16 %v2118_v1, %v2117_v3  ;;  %1932 = vmatprep.mubr.msk.f32.mxu0 %vm2241_vm2, %v2242_v27  ;;  %v2170_v7 = vpop.eup %2169 }
 0x517   : > { %v1339_v54 = vpop.permute.xlu1 %1338  ;;  %v1331_v8 = vmul.f32 %v2170_v7, %v2571_v11 }
 0x518   : > { %2015 = vmatpush3.bf16.msra.mxu0 %v2014_v4 }
 0x519   : > { %1933 = vmatmul.mubr.msk.f32.gmra.mrb[22].mxu0 %vm590_vm5, %v1097_v6  ;;  %1954 = vmatprep.subr.mxu0 %v2242_v27 }
 0x51a   : > { %1956 = vmatprep.mubr.msk.f32.mxu0 %vm2241_vm2, %v2242_v27  ;;  %v2172_v57 = vpop.eup %2171 }
 0x51b   : > { %v1333_v9 = vmul.f32 %v2172_v57, %v2575_v13  ;;  %v1480_v13 = vld [vmem:[%s2737_s5] sm:$0xff] }
 0x51c   : > { %1955 = vmatpush3.msk.msra.mxu0 %vm642_vm7, %v1339_v54  ;;  %v2017_v23 = vpack.c.bf16 %v1481_v22, %v1480_v13 }
 0x51d   : > { %1957 = vmatmul.mubr.msk.f32.vlgmr.msra.gmra.mrb[24].mxu0 %vm590_vm5, %v1329_v50 }
 0x51e   : > { %1959 = vmatprep.mubr.msk.f32.mxu0 %vm2241_vm2, %v2242_v27  ;;  %2018 = vmatpush3.bf16.msra.mxu1 %v2017_v23 }
 0x51f   : > { %2019 = vmatprep.subr.bf16.mxu1 %v2240_v24 }
 0x521   : > { %1960 = vmatmul.mubr.msk.f32.gmra.mrb[26].mxu0 %vm590_vm5, %v1331_v8 }
 0x522   : > { %1962 = vmatprep.mubr.msk.f32.mxu0 %vm2241_vm2, %v2242_v27  ;;  %2021 = vmatpush3.bf16.msra.mxu1 %v2020_v26 }
 0x525   : > { %1963 = vmatmul.mubr.msk.f32.gmra.mrb[28].mxu0 %vm590_vm5, %v1333_v9 }
 0x597   : > { %v711_v10 = vpop.f32.mrb[6].mxu0 }
 0x598   : > { %v1868_v12 = vpop.f32.mrb[7].mxu0 }
 0x59b   : > { %v716_v14 = vpop.f32.mrb[8].mxu0 }
 0x59c   : > { %v1871_v2 = vpop.f32.mrb[9].mxu0 }
 0x59f   : > { %v721_v5 = vpop.f32.mrb[10].mxu0 }
 0x5a0   : > { %v1874_v15 = vpop.f32.mrb[11].mxu0 }
 0x5b3   : > { %v947_v16 = vpop.f32.mrb[12].mxu0 }
 0x5b4   : > { %1436 = vrot.lane.b32.xlu1 %v947_v16, %s2254_s19  ;;  %v1898_v11 = vpop.f32.mrb[13].mxu0 }
 0x5b7   : > { %v952_v17 = vpop.f32.mrb[14].mxu0 }
 0x5b8   : > { %1438 = vrot.lane.b32.xlu0 %v952_v17, %s2254_s19  ;;  %v1901_v18 = vpop.f32.mrb[15].mxu0 }
 0x5bb   : > { %v957_v20 = vpop.f32.mrb[16].mxu0 }
 0x5bc   : > { %1440 = vrot.lane.b32.xlu1 %v957_v20, %s2254_s19  ;;  %v1904_v21 = vpop.f32.mrb[17].mxu0  ;;  %s2255_s19 = smov 16  }
 0x5e4   : > { %v1183_v19 = vpop.f32.mrb[18].mxu0 }
 0x5e5   : > { %1448 = vrot.lane.b32.xlu1 %v1183_v19, %s2255_s19  ;;  %v1928_v28 = vpop.f32.mrb[19].mxu0 }
 0x5e8   : > { %v1188_v29 = vpop.f32.mrb[20].mxu0 }
 0x5e9   : > { %1450 = vrot.lane.b32.xlu1 %v1188_v29, %s2255_s19  ;;  %v1931_v30 = vpop.f32.mrb[21].mxu0 }
 0x5ec   : > { %v1193_v25 = vpop.f32.mrb[22].mxu0 }
 0x5ed   : > { %1452 = vrot.lane.b32.xlu1 %v1193_v25, %s2255_s19  ;;  %v1934_v24 = vpop.f32.mrb[23].mxu0  ;;  %s2176_s19 = scalar_lea.vmem %s1622_s24, 64 }
 0x5ee   : > { %p2177_p11 = scmp.ne.s32.totalorder %s1622_s24, %s2176_s19 }
 0x5f0   : > { %v1419_v32 = vpop.f32.mrb[24].mxu0  ;;  %p2178_p12 = pnand %p2177_p11, %p2341_p5 }
 0x5f1   : > { %1460 = vrot.lane.b32.xlu1 %v1419_v32, %s2256_s20  ;;  %v1958_v33 = vpop.f32.mrb[25].mxu0 }
 0x5f2   : > { %p2179_p13 = pneg %p2178_p12 }
 0x5f4   : > { %v1424_v34 = vpop.f32.mrb[26].mxu0 }
 0x5f5   : > { %1462 = vrot.lane.b32.xlu1 %v1424_v34, %s2256_s20  ;;  %v1961_v35 = vpop.f32.mrb[27].mxu0 }
 0x5f8   : > { %v1429_v37 = vpop.f32.mrb[28].mxu0 }
 0x5f9   : > { %1464 = vrot.lane.b32.xlu1 %v1429_v37, %s2256_s20  ;;  %v1964_v31 = vpop.f32.mrb[29].mxu0  ;;  %s2257_s20 = smov [#allocation2]  }
 0x5fa   : > { %s2180_s0 = sshll.u32 %s2257_s20, 4  ;;  %s2181_s0 = int_to_ptr.vmem [resolvable:$false] %s2180_s0 }
 0x5fb   : > { %s2182_s1 = scalar_lea.vmem %s2181_s0, 128  ;;  %p2183_p0 = scmp.lt.s32.totalorder %s1622_s24, %s2181_s0 }
 0x5fc   : > { %p2184_p1 = scmp.lt.s32.totalorder %s2182_s1, %s2176_s19 }
 0x5fe   : > { %p2185_p2 = por %p2184_p1, %p2183_p0 }
 0x600   : > { %p2186_p3 = pnand %p2185_p2, %p2179_p13 }
 0x626   : > { %v1437_v38 = vpop.permute.xlu1 %1436 }
 0x627   : > { %v1469_v44 = vsel %vm494_vm3, %v711_v10, %v1437_v38 }
 0x62a   : > { %v1439_v45 = vpop.permute.xlu0 %1438 }
 0x62b   : > { %v1470_v49 = vsel %vm494_vm3, %v716_v14, %v1439_v45 }
 0x62e   : > { %v1441_v39 = vpop.permute.xlu1 %1440 }
 0x62f   : > { %v1471_v52 = vsel %vm494_vm3, %v721_v5, %v1441_v39 }
 0x657   : > { %v1449_v40 = vpop.permute.xlu1 %1448 }
 0x658   : > { %v1473_v36 = vsel %vm1472_vm11, %v1469_v44, %v1449_v40 }
 0x65b   : > { %v1451_v42 = vpop.permute.xlu1 %1450 }
 0x65c   : > { %v1474_v50 = vsel %vm1472_vm11, %v1470_v49, %v1451_v42 }
 0x65f   : > { %v1453_v43 = vpop.permute.xlu1 %1452 }
 0x660   : > { %v1475_v53 = vsel %vm1472_vm11, %v1471_v52, %v1453_v43 }
 0x663   : > { %v1461_v47 = vpop.permute.xlu1 %1460 }
 0x664   : > { %v1477_v48 = vsel %vm1476_vm12, %v1473_v36, %v1461_v47 }
 0x665   : > { %1974 = vmatmul.mubr.msk.f32.vlgmr.msra.gmra.mrb[24].mxu1 %vm322_vm0, %v1477_v48 }
 0x666   : > { %1976 = vmatprep.mubr.msk.f32.mxu1 %vm2241_vm2, %v2242_v27 }
 0x667   : > { %v1463_v41 = vpop.permute.xlu1 %1462 }
 0x668   : > { %v1478_v51 = vsel %vm1476_vm12, %v1474_v50, %v1463_v41 }
 0x669   : > { %1977 = vmatmul.mubr.msk.f32.gmra.mrb[26].mxu1 %vm322_vm0, %v1478_v51 }
 0x66a   : > { %1979 = vmatprep.mubr.msk.f32.mxu1 %vm2241_vm2, %v2242_v27 }
 0x66b   : > { %v1465_v55 = vpop.permute.xlu1 %1464 }
 0x66c   : > { %v1479_v56 = vsel %vm1476_vm12, %v1475_v53, %v1465_v55 }
 0x66d   : > { %1980 = vmatmul.mubr.msk.f32.gmra.mrb[28].mxu1 %vm322_vm0, %v1479_v56 }
 0x66e   : > { %2189 = shalt.err (!%p2186_p3)
}
 0x66f   : > { %s2190_s9 = scalar_lea.hbm %s2678_s23, 64  ;;  %s2194_s18 = scalar_lea.hbm %s2740_s8, 128 }
 0x670   : > { %p2191_p4 = scmp.ne.s32.totalorder %s2678_s23, %s2190_s9  ;;  %p2195_p9 = scmp.lt.u32.totalorder %s2678_s23, %s2740_s8 }
 0x671   : > { %p2196_p10 = scmp.lt.u32.totalorder %s2194_s18, %s2190_s9  ;;  %p2198_p12 = scmp.lt.u32.totalorder %s2190_s9, %s2678_s23 }
 0x672   : > { %p2192_p7 = pnand %p2191_p4, %p2341_p5 }
 0x673   : > { %p2197_p11 = por %p2196_p10, %p2195_p9 }
 0x674   : > { %p2193_p8 = pneg %p2192_p7 }
 0x675   : > { %p2199_p13 = por %p2198_p12, %p2197_p11 }
 0x677   : > { %p2200_p0 = pnand %p2199_p13, %p2193_p8 }
 0x679   : > { %2203 = shalt.err (!%p2200_p0)
}
 0x67a   : > { %2023 = dma.vmem_to_hbm [thread:$0]  (%p2341_p5), %s1622_s24, 64, %s2678_s23, %s1605_s26   ;;  %v1758_v27 = vld [vmem:[%s2738_s6] ss:$0 sm:$0xff]  ;;  %v2174_v4 = vld [vmem:[%s2361_s21 + $0x8] sm:$0xff]  ;;  %v2175_v57 = vld [vmem:[%s2361_s21 + $0x10] sm:$0x1] }
 0x67b   : > { %s2752_s25 = smul.u32 24, %s2353_s17  ;;  %v2173_v62 = vld [vmem:[%s2361_s21] sm:$0xff] }
 0x67d   : > { %s316_s9 = scalar_lea.vmem %s2739_s7, %s2752_s25 }
 0x738   : > { %v1566_v46 = vpop.f32.mrb[24].mxu1 }
 0x739   : > { %v1567_v58 = vadd.f32 %v1758_v27, %v1566_v46  ;;  %v1975_v60 = vpop.f32.mrb[25].mxu1 }
 0x73b   : > { %v1580_v63 = vadd.f32 %v2173_v62, %v1567_v58 }
 0x73c   : > { %v1571_v0 = vpop.f32.mrb[26].mxu1 }
 0x73d   : > { %1583 = vst.msk [vmem:[%s316_s9] sm:$0xff] %vm322_vm0, %v1580_v63  ;;  %v1572_v1 = vadd.f32 %v1758_v27, %v1571_v0  ;;  %v1978_v3 = vpop.f32.mrb[27].mxu1 }
 0x73f   : > { %v1581_v6 = vadd.f32 %v2174_v4, %v1572_v1 }
 0x740   : > { %v1576_v54 = vpop.f32.mrb[28].mxu1 }
 0x741   : > { %1584 = vst.msk [vmem:[%s316_s9 + $0x8] sm:$0xff] %vm322_vm0, %v1581_v6  ;;  %v1577_v7 = vadd.f32 %v1758_v27, %v1576_v54  ;;  %v1981_v8 = vpop.f32.mrb[29].mxu1 }
 0x743   : > { %v1582_v9 = vadd.f32 %v2175_v57, %v1577_v7 }
 0x745   : > { %1585 = vst.msk [vmem:[%s316_s9 + $0x10] sm:$0x1] %vm329_vm1, %v1582_v9 }
 0x746 PF: > { %p2029_p5 = scmp.ge.s32.totalorder %s2238_s30, 2  ;;  %s1641_s15 = sand.u32 1, %s2226_s27  }
 0x747   : > { %s1642_s17 = scalar_lea.sflag [#allocation3], %s1641_s15 }
 0x748   : > { %p2026_p1 = pnand %p2029_p5, %p2345_p6 }
 0x74a   : > { %2221 = dma.done.wait (!%p2026_p1), %s1642_s17, 64  }
 0x74b   : > { %2223 = vsyncadd (!%p2026_p1), %s1642_s17, 4294967232  ;;  %p19_p2 = scmp.ge.s32.totalorder %s2328_s11, 4   ;;  %s2753_s27 = smov %s2230_s28 }
 0x74c   : > { %s2754_s28 = smov %s2234_s29  ;;  %s2755_s29 = smov %s2339_s14 }
 0x74d   : > { %s2756_s30 = smov %s2328_s11  ;;  %21 = sbr.rel (!%p19_p2) target bundleno = 6 (0x6), region = 95 }
 0x754   :  { %1647 = vsyncpa [#allocation3], 1 }
 0x755   :  { %1649 = vsyncpa [#allocation3 + $0x1], 1 }

</bundles_post_ra>
